<compile_context>
chip_gen: v5e
topology: v5e:2x2
jax: 0.10.0
libtpu: 0.0.40
codegen_flags: <defaults>
</compile_context>

<pallas_src>
import jax
import jax.numpy as jnp
from jax import lax
from jax.experimental import pallas as pl
from jax.experimental.pallas import tpu as pltpu

_SQRT_HALF = 0.7071067811865476  # 1/sqrt(2), hoisted Python constant


def _gelu_exact(x):
    # PyTorch nn.GELU() default = exact (erf-based) GELU; evaluated in f32.
    return 0.5 * x * (1.0 + lax.erf(x * _SQRT_HALF))


def _round_up(a, b):
    return ((a + b - 1) // b) * b


# --------------------------------------------------------------------------
# Kernel
# --------------------------------------------------------------------------
def _residual_ffn_kernel(x_ref, w1_ref, b1_ref, w2_ref, b2_ref, o_ref, *scratch):
    # Grid: (row_tiles [parallel], hidden_tiles [arbitrary / reduction]).
    # x_ref : (tm, Dp)    w1_ref: (Dp, tk)   b1_ref: (1, tk)
    # w2_ref: (tk, Dp)    b2_ref: (1, Dp)    o_ref : (tm, Dp)
    # scratch: optional f32 (tm, Dp) accumulator.  Only allocated for non-f32
    # outputs; for f32 outputs we accumulate directly in the resident o_ref.
    acc_ref = scratch[0] if scratch else o_ref
    k = pl.program_id(1)

    @pl.when(k == 0)
    def _():
        # Fold the residual (x) and output bias (b2) into the accumulator
        # init -- removes two full (tm, Dp) VPU adds from the epilogue.
        acc_ref[...] = (x_ref[...].astype(jnp.float32)
                        + b2_ref[...].astype(jnp.float32))

    x = x_ref[...]  # native dtype (bf16/f32) fed straight to the MXU
    h = jnp.dot(x, w1_ref[...], preferred_element_type=jnp.float32)
    h = _gelu_exact(h + b1_ref[...].astype(jnp.float32))
    # Dropout(p=0.0) -> identity.
    h = h.astype(x.dtype)  # back to native dtype for the second MXU pass
    acc_ref[...] += jnp.dot(h, w2_ref[...], preferred_element_type=jnp.float32)
    # Dropout(p=0.0) -> identity.

    if scratch:  # static (trace-time) branch: only for non-f32 outputs
        @pl.when(k == pl.num_programs(1) - 1)
        def _():
            o_ref[...] = acc_ref[...].astype(o_ref.dtype)


# --------------------------------------------------------------------------
# Per-generation tiling / VMEM budgeting
# --------------------------------------------------------------------------
def _vmem_budget_bytes():
    """~3/4 of per-core physical VMEM (v5e/v6e 128 MiB -> ~96 MiB;
    v7x 64 MiB -> ~48 MiB).  Never requests the full physical capacity so
    Mosaic internal scratch / semaphores have headroom."""
    phys = None
    try:
        phys = getattr(pltpu.get_tpu_info(), "vmem_capacity_bytes", None)
    except Exception:
        phys = None
    if not phys:
        phys = 64 * 1024 * 1024  # conservative fallback (v7x per-TC size)
    return int(phys) * 3 // 4


_ROW_TILE_CANDIDATES = (1024, 768, 640, 512, 384, 256, 192, 128, 64, 32, 16, 8)


def _pick_row_tile(M, dim_p, tk, in_sz, out_sz, use_scratch, budget):
    m8 = _round_up(M, 8)
    # VMEM independent of tm: double-buffered w1/w2 hidden tiles + biases.
    fixed = 2 * (dim_p * tk * in_sz) * 2 + 2 * (tk + dim_p) * in_sz
    # VMEM per row: double-buffered x tile + out tile (+ f32 scratch row).
    per_row = dim_p * (2 * in_sz + 2 * out_sz + (4 if use_scratch else 0))
    headroom = 2 * 1024 * 1024
    tm_cap = (budget - fixed - headroom) // per_row
    cands = [t for t in _ROW_TILE_CANDIDATES if t <= tm_cap and t <= m8]
    if not cands:
        return None  # this tk doesn't fit the budget; caller tries smaller tk
    want_split = m8 >= 16  # enough rows to keep both TCs busy (v7x / megacore)
    best, best_key = None, None
    for tm in cands:
        m_p = _round_up(m8, tm)
        n_tiles = m_p // tm
        pad_waste = (m_p - M) / max(M, 1)
        key = (
            1 if (want_split and n_tiles < 2) else 0,  # keep >= 2 row tiles
            1 if pad_waste > 0.125 else 0,             # avoid over-padding rows
            -tm,                                       # then: biggest tile wins
        )
        if best_key is None or key < best_key:
            best, best_key = tm, key
    return best


def _pick_tiles(M, dim, hidden, in_dtype, out_dtype, use_scratch, budget):
    dim_p = _round_up(dim, 128)
    hid_base = _round_up(hidden, 128)
    in_sz = jnp.dtype(in_dtype).itemsize
    out_sz = jnp.dtype(out_dtype).itemsize
    best = None
    # Sweep tk: if the weight double-buffer at tk=512 squeezes tm (tight v7x
    # budget), a smaller tk frees VMEM for a bigger tm -- the axis that
    # actually raises arithmetic intensity.
    for tk_try in (512, 256, 128):
        tk = min(tk_try, hid_base)
        hid_p = _round_up(hid_base, tk)
        tm = _pick_row_tile(M, dim_p, tk, in_sz, out_sz, use_scratch, budget)
        if tm is None:
            continue
        m_p = _round_up(_round_up(M, 8), tm)
        hid_waste = (hid_p - hidden) / max(hidden, 1)
        key = (-tm, hid_waste, -tk)
        if best is None or key < best[0]:
            best = (key, tm, tk, m_p, dim_p, hid_p)
    if best is None:  # tiny budget fallback: smallest lane-dense tiles
        return 8, 128, _round_up(M, 8), dim_p, _round_up(hidden, 128)
    _, tm, tk, m_p, dim_p, hid_p = best
    return tm, tk, m_p, dim_p, hid_p


# --------------------------------------------------------------------------
# Wrapper
# --------------------------------------------------------------------------
def residual_feedforward(x, w1, b1, w2, b2):
    """out = (GELU(x @ w1 + b1) @ w2 + b2) + x ;  x: [batch, seq, dim]."""
    batch, seq, dim = x.shape
    hidden = w1.shape[1]
    M = batch * seq

    out_dtype = x.dtype
    use_scratch = out_dtype != jnp.float32  # f32 outputs accumulate in o_ref

    budget = _vmem_budget_bytes()
    tm, tk, m_p, dim_p, hid_p = _pick_tiles(
        M, dim, hidden, x.dtype, out_dtype, use_scratch, budget)

    def pad2(a, r, c):
        pr, pc = r - a.shape[0], c - a.shape[1]
        return a if (pr == 0 and pc == 0) else jnp.pad(a, ((0, pr), (0, pc)))

    # NOTE: in a real model the lane-dense (padded) weights would be prepared
    # once at init and cached; here padding is skipped when already aligned.
    x2d = pad2(x.reshape(M, dim), m_p, dim_p)
    w1p = pad2(w1, dim_p, hid_p)
    b1p = pad2(b1.reshape(1, hidden), 1, hid_p)
    w2p = pad2(w2, hid_p, dim_p)
    b2p = pad2(b2.reshape(1, dim), 1, dim_p)

    grid = (m_p // tm, hid_p // tk)
    in_sz = jnp.dtype(x.dtype).itemsize
    out_sz = jnp.dtype(out_dtype).itemsize

    cost = pl.CostEstimate(
        flops=4 * m_p * dim_p * hid_p,                          # two matmuls
        transcendentals=m_p * hid_p,                            # GELU erf
        bytes_accessed=(m_p * dim_p * (in_sz + out_sz)          # x in, out
                        + grid[0] * 2 * dim_p * hid_p * in_sz   # w1+w2 / row tile
                        + (hid_p + dim_p) * in_sz),             # biases
    )

    scratch_shapes = ([pltpu.VMEM((tm, dim_p), jnp.float32)]
                      if use_scratch else [])

    out2d = pl.pallas_call(
        _residual_ffn_kernel,
        out_shape=jax.ShapeDtypeStruct((m_p, dim_p), out_dtype),
        grid_spec=pltpu.PrefetchScalarGridSpec(
            num_scalar_prefetch=0,
            grid=grid,
            in_specs=[
                pl.BlockSpec((tm, dim_p), lambda i, k: (i, 0)),   # x row tile
                pl.BlockSpec((dim_p, tk), lambda i, k: (0, k)),   # w1 hidden tile
                pl.BlockSpec((1, tk), lambda i, k: (0, k)),       # b1 hidden tile
                pl.BlockSpec((tk, dim_p), lambda i, k: (k, 0)),   # w2 hidden tile
                pl.BlockSpec((1, dim_p), lambda i, k: (0, 0)),    # b2 (resident)
            ],
            out_specs=pl.BlockSpec((tm, dim_p), lambda i, k: (i, 0)),
            scratch_shapes=scratch_shapes,
        ),
        compiler_params=pltpu.CompilerParams(
            dimension_semantics=("parallel", "arbitrary"),
            vmem_limit_bytes=int(budget),
        ),
        cost_estimate=cost,
    )(x2d, w1p, b1p, w2p, b2p)

    return out2d[:M, :dim].reshape(batch, seq, dim)


def _reference(x, w1, b1, w2, b2):
    # Mirrors the kernel's numerics: native-dtype matmuls, f32 accumulation.
    M = x.shape[0] * x.shape[1]
    x2 = x.reshape(M, x.shape[-1])
    h = jnp.dot(x2, w1, preferred_element_type=jnp.float32)
    h = _gelu_exact(h + b1.astype(jnp.float32))
    h = h.astype(x.dtype)
    y = jnp.dot(h, w2, preferred_element_type=jnp.float32)
    y = y + b2.astype(jnp.float32) + x2.astype(jnp.float32)
    return y.reshape(x.shape).astype(x.dtype)


if __name__ == "__main__":
    # Small shapes consistent with the module's forward: [batch, seq, dim].
    batch, seq, dim, hidden = 2, 8, 32, 64

    key = jax.random.PRNGKey(0)
    kx, kw1, kb1, kw2, kb2 = jax.random.split(key, 5)

    bound1 = 1.0 / (dim ** 0.5)
    bound2 = 1.0 / (hidden ** 0.5)
    x_f32 = jax.random.normal(kx, (batch, seq, dim), dtype=jnp.float32)
    w1_f32 = jax.random.uniform(kw1, (dim, hidden), jnp.float32, -bound1, bound1)
    b1_f32 = jax.random.uniform(kb1, (hidden,), jnp.float32, -bound1, bound1)
    w2_f32 = jax.random.uniform(kw2, (hidden, dim), jnp.float32, -bound2, bound2)
    b2_f32 = jax.random.uniform(kb2, (dim,), jnp.float32, -bound2, bound2)

    # f32 operands (no scratch path: accumulate directly in o_ref).
    out = jax.block_until_ready(
        residual_feedforward(x_f32, w1_f32, b1_f32, w2_f32, b2_f32))
    ref = _reference(x_f32, w1_f32, b1_f32, w2_f32, b2_f32)
    assert out.shape == (batch, seq, dim)
    assert jnp.allclose(out, ref, atol=1e-5, rtol=1e-5)

    # bf16 operands (MXU-native path, f32 scratch accumulator).
    args_bf16 = tuple(a.astype(jnp.bfloat16)
                      for a in (x_f32, w1_f32, b1_f32, w2_f32, b2_f32))
    out_bf16 = jax.block_until_ready(residual_feedforward(*args_bf16))
    ref_bf16 = _reference(*args_bf16)
    assert out_bf16.dtype == jnp.bfloat16
    assert jnp.allclose(out_bf16.astype(jnp.float32),
                        ref_bf16.astype(jnp.float32), atol=5e-2, rtol=5e-2)

    print("KERNEL_OK")
</pallas_src>

<mosaic_0001>
module attributes {stable_mosaic.version = 11 : i64} {
  func.func @_residual_ffn_kernel(%arg0: i32, %arg1: i32, %arg2: memref<8x128xf32, #tpu.memory_space<vmem>>, %arg3: memref<128x128xf32, #tpu.memory_space<vmem>>, %arg4: memref<1x128xf32, #tpu.memory_space<vmem>>, %arg5: memref<128x128xf32, #tpu.memory_space<vmem>>, %arg6: memref<1x128xf32, #tpu.memory_space<vmem>>, %arg7: memref<8x128xf32, #tpu.memory_space<vmem>>) attributes {dimension_semantics = [#tpu.dimension_semantics<parallel>, #tpu.dimension_semantics<arbitrary>], iteration_bounds = array<i64: 2, 1>, scalar_prefetch = 0 : i64, scratch_operands = 0 : i64, tpu.core_type = #tpu.core_type<tc>, window_params = [{transform_indices = @transform_0, window_bounds = array<i64: 8, 128>}, {transform_indices = @transform_1, window_bounds = array<i64: 128, 128>}, {transform_indices = @transform_2, window_bounds = array<i64: 1, 128>}, {transform_indices = @transform_3, window_bounds = array<i64: 128, 128>}, {pipeline_mode = #tpu.pipeline_mode<synchronous>, transform_indices = @transform_4, window_bounds = array<i64: 1, 128>}, {transform_indices = @transform_5, window_bounds = array<i64: 8, 128>}]} {
    %c0_i32 = arith.constant 0 : i32
    %0 = arith.cmpi eq, %arg1, %c0_i32 : i32
    %1 = arith.extui %0 : i1 to i32
    %c0_i32_0 = arith.constant 0 : i32
    %2 = arith.cmpi ne, %1, %c0_i32_0 : i32
    scf.if %2 {
      %c0_16 = arith.constant 0 : index
      %c0_17 = arith.constant 0 : index
      %22 = vector.load %arg2[%c0_16, %c0_17] : memref<8x128xf32, #tpu.memory_space<vmem>>, vector<8x128xf32>
      %c0_18 = arith.constant 0 : index
      %c0_19 = arith.constant 0 : index
      %23 = vector.load %arg6[%c0_18, %c0_19] : memref<1x128xf32, #tpu.memory_space<vmem>>, vector<1x128xf32>
      %24 = vector.broadcast %23 : vector<1x128xf32> to vector<8x128xf32>
      %25 = arith.addf %22, %24 : vector<8x128xf32>
      %c0_20 = arith.constant 0 : index
      %c0_21 = arith.constant 0 : index
      %26 = vector.load %arg7[%c0_20, %c0_21] : memref<8x128xf32, #tpu.memory_space<vmem>>, vector<8x128xf32>
      tpu.vector_store %arg7[%c0_20, %c0_21], %25 {strides = array<i32>} : memref<8x128xf32, #tpu.memory_space<vmem>>, vector<8x128xf32>,
    } else {
    }
    %c0 = arith.constant 0 : index
    %c0_1 = arith.constant 0 : index
    %3 = vector.load %arg2[%c0, %c0_1] : memref<8x128xf32, #tpu.memory_space<vmem>>, vector<8x128xf32>
    %c0_2 = arith.constant 0 : index
    %c0_3 = arith.constant 0 : index
    %4 = vector.load %arg3[%c0_2, %c0_3] : memref<128x128xf32, #tpu.memory_space<vmem>>, vector<128x128xf32>
    %cst = arith.constant dense<0.000000e+00> : vector<8x128xf32>
    %5 = tpu.matmul %3, %4, %cst {dimension_numbers = #tpu.dot_dimension_numbers<[1], [0], [0], [1], [0, 0, 1, 1], [], []>} : vector<8x128xf32>, vector<128x128xf32>, vector<8x128xf32> -> vector<8x128xf32>
    %c0_4 = arith.constant 0 : index
    %c0_5 = arith.constant 0 : index
    %6 = vector.load %arg4[%c0_4, %c0_5] : memref<1x128xf32, #tpu.memory_space<vmem>>, vector<1x128xf32>
    %7 = vector.broadcast %6 : vector<1x128xf32> to vector<8x128xf32>
    %8 = arith.addf %5, %7 : vector<8x128xf32>
    %cst_6 = arith.constant 5.000000e-01 : f32
    %9 = vector.broadcast %cst_6 : f32 to vector<8x128xf32>
    %10 = arith.mulf %9, %8 : vector<8x128xf32>
    %cst_7 = arith.constant 0.707106769 : f32
    %11 = vector.broadcast %cst_7 : f32 to vector<8x128xf32>
    %12 = arith.mulf %8, %11 : vector<8x128xf32>
    %13 = math.erf %12 : vector<8x128xf32>
    %cst_8 = arith.constant 1.000000e+00 : f32
    %14 = vector.broadcast %cst_8 : f32 to vector<8x128xf32>
    %15 = arith.addf %14, %13 : vector<8x128xf32>
    %16 = arith.mulf %10, %15 : vector<8x128xf32>
    %c0_9 = arith.constant 0 : index
    %c0_10 = arith.constant 0 : index
    %17 = vector.load %arg7[%c0_9, %c0_10] : memref<8x128xf32, #tpu.memory_space<vmem>>, vector<8x128xf32>
    %c0_11 = arith.constant 0 : index
    %c0_12 = arith.constant 0 : index
    %18 = vector.load %arg5[%c0_11, %c0_12] : memref<128x128xf32, #tpu.memory_space<vmem>>, vector<128x128xf32>
    %cst_13 = arith.constant dense<0.000000e+00> : vector<8x128xf32>
    %19 = tpu.matmul %16, %18, %cst_13 {dimension_numbers = #tpu.dot_dimension_numbers<[1], [0], [0], [1], [0, 0, 1, 1], [], []>} : vector<8x128xf32>, vector<128x128xf32>, vector<8x128xf32> -> vector<8x128xf32>
    %20 = arith.addf %17, %19 : vector<8x128xf32>
    %c0_14 = arith.constant 0 : index
    %c0_15 = arith.constant 0 : index
    %21 = vector.load %arg7[%c0_14, %c0_15] : memref<8x128xf32, #tpu.memory_space<vmem>>, vector<8x128xf32>
    tpu.vector_store %arg7[%c0_14, %c0_15], %20 {strides = array<i32>} : memref<8x128xf32, #tpu.memory_space<vmem>>, vector<8x128xf32>,
    return
  }
  func.func @transform_0(%arg0: i32, %arg1: i32) -> (i32, i32) {
    %c0_i32 = arith.constant 0 : i32
    %c0_i32_0 = arith.constant 0 : i32
    return %arg0, %c0_i32 : i32, i32
  }
  func.func @transform_1(%arg0: i32, %arg1: i32) -> (i32, i32) {
    %c0_i32 = arith.constant 0 : i32
    %c0_i32_0 = arith.constant 0 : i32
    return %c0_i32, %arg1 : i32, i32
  }
  func.func @transform_2(%arg0: i32, %arg1: i32) -> (i32, i32) {
    %c0_i32 = arith.constant 0 : i32
    %c0_i32_0 = arith.constant 0 : i32
    return %c0_i32, %arg1 : i32, i32
  }
  func.func @transform_3(%arg0: i32, %arg1: i32) -> (i32, i32) {
    %c0_i32 = arith.constant 0 : i32
    %c0_i32_0 = arith.constant 0 : i32
    return %arg1, %c0_i32 : i32, i32
  }
  func.func @transform_4(%arg0: i32, %arg1: i32) -> (i32, i32) {
    %c0_i32 = arith.constant 0 : i32
    %c0_i32_0 = arith.constant 0 : i32
    %c0_i32_1 = arith.constant 0 : i32
    return %c0_i32, %c0_i32_0 : i32, i32
  }
  func.func @transform_5(%arg0: i32, %arg1: i32) -> (i32, i32) {
    %c0_i32 = arith.constant 0 : i32
    %c0_i32_0 = arith.constant 0 : i32
    return %arg0, %c0_i32 : i32, i32
  }
}

</mosaic_0001>

<bundles_post_ra>
// kernel: tpu_custom_call.1
= control target key start
LH: loop header
LB: loop body
LE: loop exit
PB: predicated region body
PF: predicated region fallthrough
CT: control target
= control target key end

     0   :  { %10 = vsyncpa [#allocation3], 0  ;;  %s1062_s0 = inlined_call_operand.hbm [shape: f32[16,128], index: 0, kind: input, shape index: {}]   ;;  %s1063_s1 = inlined_call_operand.hbm [shape: f32[128,128], index: 1, kind: input, shape index: {}]   ;;  %s1064_s2 = inlined_call_operand.vmem [shape: f32[1,128], index: 2, kind: input, shape index: {}]   ;;  %s1065_s3 = inlined_call_operand.hbm [shape: f32[128,128], index: 3, kind: input, shape index: {}]   ;;  %s1066_s4 = inlined_call_operand.vmem [shape: f32[1,128], index: 4, kind: input, shape index: {}]   ;;  %s1067_s5 = inlined_call_operand.hbm [shape: f32[16,128], index: 5, kind: output, shape index: {}]  }
   0x1   :  { %12 = vsyncpa [#allocation3 + $0x1], 0 }
   0x2   :  { %13 = vsyncpa [#allocation6], 0 }
   0x3   :  { %14 = vsyncpa [#allocation4], 0 }
   0x4   :  { %16 = vsyncpa [#allocation4 + $0x1], 0  ;;  %s901_s18 = smov 0   ;;  %s903_s19 = smov 0  }
   0x5   :  { %s905_s20 = smov 0   ;;  %s907_s21 = smov 0  }
   0x6   :  { %s909_s22 = smov 0   ;;  %s911_s23 = smov 0  }
   0x7 LB: > { %s581_s24 = sadd.s32 4294967295, %s865_s23   ;;  %p583_p0 = scmp.ge.s32.totalorder %s865_s23, 1  ;;  %s865_s23 = sphi %s911_s23, %s22_s23   ;;  %s861_s22 = sphi %s909_s22, %s1077_s22   ;;  %s857_s21 = sphi %s907_s21, %s1076_s21   ;;  %s853_s20 = sphi %s905_s20, %s1075_s20   ;;  %s849_s19 = sphi %s903_s19, %s1074_s19   ;;  %s845_s18 = sphi %s901_s18, %s1073_s18  }
   0x8   : > { %p935_p1 = scmp.eq.s32.totalorder %s581_s24, 0  ;;  %p190_p2 = scmp.lt.s32.totalorder %s865_s23, 3 }
   0x9   : > { %s203_s28 = sshll.u32 %s1063_s1, 4  ;;  %s867_s30 = smov [#allocation5]   ;;  %s204_s28 = int_to_ptr.hbm [resolvable:$true] %s203_s28 }
   0xa   : > { %p943_p3 = pnand %p583_p0, %p190_p2  ;;  %s205_s6 = sshll.u32 %s867_s30, 4  ;;  %s206_s6 = int_to_ptr.vmem [resolvable:$true] %s205_s6 }
   0xb   : > { %p587_p6 = scmp.ge.s32.totalorder %s865_s23, 2  ;;  %s226_s9 = sshll.u32 %s1065_s3, 4  ;;  %s227_s9 = int_to_ptr.hbm [resolvable:$true] %s226_s9 }
   0xc   : > { %p612_p4 = pneg %p943_p3  ;;  %s868_s10 = smov 128  }
   0xd   : > { %s869_s11 = smov 8   ;;  %s870_s12 = smov [#allocation7]  }
   0xe   : > { %p613_p5 = pnand %p612_p4, %p935_p1  ;;  %s228_s13 = sshll.u32 %s870_s12, 4  ;;  %s229_s13 = int_to_ptr.vmem [resolvable:$true] %s228_s13 }
   0xf   : > { %s34_s14 = sadd.s32 1, %s861_s22  ;;  %s582_s15 = sadd.s32 4294967294, %s865_s23  }
  0x10   : > { %615 = dma.hbm_to_vmem [thread:$0]  (!%p613_p5), %s204_s28, 2048, %s206_s6, [#allocation6], %s868_s10, %s868_s10, %s869_s11  }
  0x11   : > { %618 = dma.hbm_to_vmem [thread:$0]  (!%p613_p5), %s227_s9, 2048, %s229_s13, [#allocation6], %s868_s10, %s868_s10, %s869_s11  }
  0x12   : > { %p36_p7 = scmp.ge.s32.totalorder %s34_s14, 2  ;;  %s41_s16 = sadd.s32 1, %s853_s20 }
  0x13   : > { %p48_p8 = scmp.ne.s32.totalorder %s853_s20, %s849_s19  ;;  %p49_p9 = scmp.eq.s32.totalorder %s865_s23, 0 }
  0x14   : > { %s1079_s14 = smov (%p36_p7, %s34_s14), 0  ;;  %p54_p10 = scmp.ne.s32.totalorder %s849_s19, %s845_s18 }
  0x15   : > { %s38_s17 = ssub.s32 %s861_s22, %s1079_s14  ;;  %p177_p11 = scmp.eq.s32.totalorder %s581_s24, 1 }
  0x16   : > { %p39_p12 = scmp.eq.s32.totalorder %s38_s17, 0  ;;  %p971_p13 = por %p935_p1, %p54_p10 }
  0x17   : > { %p975_p0 = por %p177_p11, %p48_p8  ;;  %p183_p2 = scmp.eq.s32.totalorder %s582_s15, 1 }
  0x18   : > { %s980_s28 = scalar_select %p39_p12, %s853_s20, %s41_s16  }
  0x19   : > { %p50_p4 = por %p49_p9, %p48_p8  ;;  %p982_p5 = por %p183_p2, %p54_p10 }
  0x1a   : > { %s245_s6 = sand.u32 1, %s853_s20   ;;  %s589_s24 = sshll.u32 %s861_s22, 3 }
  0x1b   : > { %p629_p7 = scmp.lt.s32.totalorder %s865_s23, 2  ;;  %s588_s7 = sshll.u32 %s245_s6, 3 }
  0x1c   : > { %s253_s10 = scalar_lea.hbm %s1062_s0, %s589_s24  ;;  %s249_s12 = scalar_lea.vmem [#allocation2], %s588_s7 }
  0x1d   : > { %s255_s11 = sshll.u32 %s253_s10, 4  ;;  %s257_s13 = sshll.u32 %s249_s12, 4  ;;  %s256_s11 = int_to_ptr.hbm [resolvable:$true] %s255_s11  ;;  %s258_s13 = int_to_ptr.vmem [resolvable:$true] %s257_s13 }
  0x1e   : > { %p620_p11 = pnand %p629_p7, %p50_p4  ;;  %s246_s15 = scalar_lea.sflag [#allocation3], %s245_s6 }
  0x1f   : > { %266 = sbr.rel (%p943_p3) target bundleno = 381 (0x17d), region = 40  ;;  %s995_s16 = sand.u32 (!%p943_p3), 1, %s849_s19  }
  0x20   : > { %622 = dma.hbm_to_vmem [thread:$0]  (!%p620_p11), %s256_s11, 128, %s258_s13, %s246_s15  }
  0x21   : > { %s591_s17 = sshll.u32 (!%p943_p3), %s995_s16, 3  ;;  %s269_s24 = scalar_lea.sflag (!%p943_p3), [#allocation3], %s995_s16 }
  0x22   : > { %s1001_s7 = scalar_lea.vmem (!%p943_p3), [#allocation2], %s591_s17 }
  0x24   : > { %832 = dma.done.wait (%p971_p13), %s269_s24, 128  }
  0x25   : > { %834 = vsyncadd (%p971_p13), %s269_s24, 4294967168 }
  0x26   : > { %836 = dma.done.wait (%p935_p1), [#allocation6], 4096  }
  0x27   : > { %838 = vsyncadd (%p935_p1), [#allocation6], 4294963200  ;;  %v344_v0 = vld [vmem:[#allocation5 + $0x78] sm:$0xff]  ;;  %v343_v1 = vld [vmem:[#allocation5 + $0x70] sm:$0xff]  ;;  %s597_s26 = sshll.u32 %s857_s21, 3  ;;  %s312_s12 = scalar_lea.vmem [#allocation8], %s591_s17 }
  0x28   : > { %349 = vmatpush.msra.mxu0 %v344_v0  ;;  %v342_v2 = vld [vmem:[#allocation5 + $0x68] sm:$0xff]  ;;  %v341_v3 = vld [vmem:[#allocation5 + $0x60] sm:$0xff]  ;;  %v340_v4 = vld [vmem:[#allocation5 + $0x58] sm:$0xff]  ;;  %s463_s11 = scalar_lea.hbm %s1067_s5, %s597_s26  ;;  %s465_s13 = sshll.u32 %s312_s12, 4  ;;  %s466_s13 = int_to_ptr.vmem [resolvable:$true] %s465_s13 }
  0x29   : > { %v339_v5 = vld [vmem:[#allocation5 + $0x50] sm:$0xff]  ;;  %v338_v6 = vld [vmem:[#allocation5 + $0x48] sm:$0xff]  ;;  %v337_v7 = vld [vmem:[#allocation5 + $0x40] sm:$0xff]  ;;  %s467_s15 = sshll.u32 %s463_s11, 4  ;;  %s453_s21 = scalar_lea.sflag [#allocation4], %s995_s16  ;;  %s468_s15 = int_to_ptr.hbm [resolvable:$true] %s467_s15 }
  0x2a   : > { %350 = vmatpush.msra.mxu0 %v343_v1  ;;  %v336_v8 = vld [vmem:[#allocation5 + $0x38] sm:$0xff]  ;;  %v335_v9 = vld [vmem:[#allocation5 + $0x30] sm:$0xff]  ;;  %v334_v10 = vld [vmem:[#allocation5 + $0x28] sm:$0xff]  ;;  %s793_s24 = sshra.s32 %s468_s15, 4  ;;  %s799_s26 = scalar_lea.hbm %s1067_s5, 16  ;;  %s794_s24 = int_to_ptr.hbm [resolvable:$true] %s793_s24 }
  0x2b   : > { %v333_v11 = vld [vmem:[#allocation5 + $0x20] sm:$0xff]  ;;  %v332_v12 = vld [vmem:[#allocation5 + $0x18] sm:$0xff]  ;;  %v331_v13 = vld [vmem:[#allocation5 + $0x10] sm:$0xff]  ;;  %p800_p9 = scmp.lt.s32.totalorder %s794_s24, %s1067_s5 }
  0x2c   : > { %351 = vmatpush.msra.mxu0 %v342_v2  ;;  %v330_v14 = vld [vmem:[#allocation5 + $0x8] sm:$0xff]  ;;  %v329_v15 = vld [vmem:[#allocation5] sm:$0xff]  ;;  %v1012_v16 = vld [vmem:[%s1001_s7] sm:$0xff]  ;;  %s795_s7 = scalar_lea.hbm %s794_s24, 8 }
  0x2d   : > { %v429_v17 = vld [vmem:[#allocation7 + $0x78] sm:$0xff]  ;;  %v428_v18 = vld [vmem:[#allocation7 + $0x70] sm:$0xff]  ;;  %v427_v19 = vld [vmem:[#allocation7 + $0x68] sm:$0xff]  ;;  %p796_p1 = scmp.ne.s32.totalorder %s794_s24, %s795_s7  ;;  %p801_p10 = scmp.lt.s32.totalorder %s799_s26, %s795_s7 }
  0x2e   : > { %352 = vmatpush.msra.mxu0 %v341_v3  ;;  %430 = vmatpush.msra.mxu1 %v429_v17  ;;  %v426_v20 = vld [vmem:[#allocation7 + $0x60] sm:$0xff]  ;;  %v685_v21 = vld [vmem:[%s1064_s2] ss:$0 sm:$0xff]  ;;  %v425_v22 = vld [vmem:[#allocation7 + $0x58] sm:$0xff] }
  0x2f   : > { %v424_v23 = vld [vmem:[#allocation7 + $0x50] sm:$0xff]  ;;  %v423_v25 = vld [vmem:[#allocation7 + $0x48] sm:$0xff]  ;;  %v422_v27 = vld [vmem:[#allocation7 + $0x40] sm:$0xff]  ;;  %p797_p3 = pnand %p796_p1, %p975_p0  ;;  %p802_p12 = por %p801_p10, %p800_p9 }
  0x30   : > { %353 = vmatpush.msra.mxu0 %v340_v4  ;;  %431 = vmatpush.msra.mxu1 %v428_v18  ;;  %v421_v29 = vld [vmem:[#allocation7 + $0x38] sm:$0xff]  ;;  %v420_v31 = vld [vmem:[#allocation7 + $0x30] sm:$0xff]  ;;  %v419_v33 = vld [vmem:[#allocation7 + $0x28] sm:$0xff] }
  0x31   : > { %v418_v36 = vld [vmem:[#allocation7 + $0x20] sm:$0xff]  ;;  %v417_v39 = vld [vmem:[#allocation7 + $0x18] sm:$0xff]  ;;  %v416_v42 = vld [vmem:[#allocation7 + $0x10] sm:$0xff]  ;;  %p798_p8 = pneg %p797_p3 }
  0x32   : > { %354 = vmatpush.msra.mxu0 %v339_v5  ;;  %432 = vmatpush.msra.mxu1 %v427_v19  ;;  %v415_v45 = vld [vmem:[#allocation7 + $0x8] sm:$0xff]  ;;  %v414_v47 = vld [vmem:[#allocation7] sm:$0xff] }
  0x33   : > { %p803_p13 = pnand %p802_p12, %p798_p8 }
  0x34   : > { %355 = vmatpush.msra.mxu0 %v338_v6  ;;  %433 = vmatpush.msra.mxu1 %v426_v20 }
  0x36   : > { %356 = vmatpush.msra.mxu0 %v337_v7  ;;  %434 = vmatpush.msra.mxu1 %v425_v22 }
  0x38   : > { %357 = vmatpush.msra.mxu0 %v336_v8  ;;  %435 = vmatpush.msra.mxu1 %v424_v23 }
  0x3a   : > { %358 = vmatpush.msra.mxu0 %v335_v9  ;;  %436 = vmatpush.msra.mxu1 %v423_v25 }
  0x3c   : > { %359 = vmatpush.msra.mxu0 %v334_v10  ;;  %437 = vmatpush.msra.mxu1 %v422_v27 }
  0x3e   : > { %360 = vmatpush.msra.mxu0 %v333_v11  ;;  %438 = vmatpush.msra.mxu1 %v421_v29  ;;  %v686_v11 = vld [vmem:[%s1066_s4] ss:$0 sm:$0xff] }
  0x40   : > { %361 = vmatpush.msra.mxu0 %v332_v12  ;;  %439 = vmatpush.msra.mxu1 %v420_v31  ;;  %v326_v12 = vadd.f32 %v686_v11, %v1012_v16 }
  0x42   : > { %362 = vmatpush.msra.mxu0 %v331_v13  ;;  %440 = vmatpush.msra.mxu1 %v419_v33 }
  0x44   : > { %363 = vmatpush.msra.mxu0 %v330_v14  ;;  %441 = vmatpush.msra.mxu1 %v418_v36 }
  0x46   : > { %364 = vmatpush.msra.mxu0 %v329_v15  ;;  %442 = vmatpush.msra.mxu1 %v417_v39 }
  0x47   : > { %365 = vmatmul.f32.vlgmr.msra.gmra.mxu0 %v1012_v16 }
  0x48   : > { %443 = vmatpush.msra.mxu1 %v416_v42 }
  0x4a   : > { %444 = vmatpush.msra.mxu1 %v415_v45 }
  0x4c   : > { %445 = vmatpush.msra.mxu1 %v414_v47 }
  0xc4   : > { %v366_v24 = vpop.f32.mrf.mxu0 }
  0xc5   : > { %v367_v26 = vadd.f32 %v685_v21, %v366_v24 }
  0xc7   : > { %v370_v28 = vmul.f32 0.70710677, %v367_v26  ;;  %v369_v8 = vmul.f32 0.5, %v367_v26 }
  0xc9   : > { %v371_v30 = vmul.f32 %v370_v28, %v370_v28 }
  0xcb   : > { %v372_v32 = vmin.f32 %v371_v30, 16.0 }
  0xcd   : > { %v373_v34 = vmul.f32 2.1237322e-06, %v372_v32  ;;  %v384_v35 = vmul.f32 3.8918573e-05, %v372_v32 }
  0xcf   : > { %v374_v37 = vadd.f32 0.00028619796, %v373_v34  ;;  %v385_v38 = vadd.f32 0.001143296, %v384_v35 }
  0xd1   : > { %v375_v40 = vmul.f32 %v374_v37, %v372_v32  ;;  %v386_v41 = vmul.f32 %v385_v38, %v372_v32 }
  0xd3   : > { %v387_v43 = vadd.f32 0.014752088, %v386_v41  ;;  %v376_v44 = vadd.f32 0.0036580483, %v375_v40 }
  0xd5   : > { %v388_v46 = vmul.f32 %v387_v43, %v372_v32  ;;  %v377_v49 = vmul.f32 %v376_v44, %v372_v32 }
  0xd7   : > { %v389_v48 = vadd.f32 0.112945676, %v388_v46  ;;  %v378_v52 = vadd.f32 0.05243302, %v377_v49 }
  0xd9   : > { %v390_v50 = vmul.f32 %v389_v48, %v372_v32  ;;  %v379_v55 = vmul.f32 %v378_v52, %v372_v32 }
  0xdb   : > { %v391_v51 = vadd.f32 0.4994258, %v390_v50  ;;  %v380_v56 = vadd.f32 0.18741608, %v379_v55 }
  0xdd   : > { %v392_v53 = vmul.f32 %v391_v51, %v372_v32  ;;  %v381_v58 = vmul.f32 %v380_v56, %v372_v32 }
  0xdf   : > { %v393_v54 = vadd.f32 1.0, %v392_v53  ;;  %v382_v62 = vadd.f32 1.1283791, %v381_v58 }
  0xe1   : > { %687 = vrcp.f32 %v393_v54  ;;  %v405_v61 = vand.u32 2147483648, %v393_v54  ;;  %v403_v0 = vand.u32 2147483647, %v393_v54  ;;  %vm399_vm1 = vweird.f32 %v393_v54 }
  0xe2   : > { %v383_v3 = vmul.f32 %v382_v62, %v370_v28 }
  0xe3   : > { %v406_v2 = vor.u32 1.1754944e-38, %v405_v61  ;;  %vm404_vm3 = vcmp.eq.f32.partialorder %v403_v0, 8.507059e+37 }
  0xe7   : > { %v688_v57 = vpop.eup %687 }
  0xe8   : > { %v395_v59 = vmul.f32 %v688_v57, %v393_v54  ;;  %vm400_vm0 = vweird.f32 %v688_v57 }
  0xe9   : > { %vm401_vm2 = vmor %vm399_vm1, %vm400_vm0 }
  0xea   : > { %v396_v60 = vsub.f32 1.0, %v395_v59 }
  0xec   : > { %v397_v63 = vmul.f32 %v688_v57, %v396_v60 }
  0xee   : > { %v398_v1 = vadd.f32 %v688_v57, %v397_v63 }
  0xf0   : > { %v402_v4 = vsel %vm401_vm2, %v688_v57, %v398_v1 }
  0xf1   : > { %v407_v5 = vsel %vm404_vm3, %v406_v2, %v402_v4 }
  0xf2   : > { %v408_v6 = vmul.f32 %v407_v5, %v383_v3 }
  0xf4   : > { %v595_v7 = vclamps-f32 %v408_v6, 1.0 }
  0xf6   : > { %v411_v9 = vadd.f32 1.0, %v595_v7 }
  0xf8   : > { %v412_v10 = vmul.f32 %v411_v9, %v369_v8 }
  0xfa   : > { %446 = vmatmul.f32.vlgmr.msra.gmra.mxu1 %v412_v10 }
 0x177   : > { %v447_v13 = vpop.f32.mrf.mxu1 }
 0x178   : > { %v450_v14 = vadd.f32 %v447_v13, %v326_v12 }
 0x17a   : > { %451 = vst [vmem:[%s312_s12] sm:$0xff] %v450_v14 }
 0x17b   : > { %806 = shalt.err (!%p803_p13)
}
 0x17c   : > { %610 = dma.vmem_to_hbm [thread:$0]  (%p975_p0), %s466_s13, 128, %s468_s15, %s453_s21  }
 0x17d PF: > { %s479_s16 = sand.u32 1, %s845_s18   ;;  %p624_p2 = pnand %p587_p6, %p982_p5 }
 0x17e   : > { %s480_s8 = scalar_lea.sflag [#allocation4], %s479_s16 }
 0x17f   : > { %p625_p4 = pneg %p624_p2 }
 0x181   : > { %840 = dma.done.wait (%p625_p4), %s480_s8, 128  }
 0x182   : > { %842 = vsyncadd (%p625_p4), %s480_s8, 4294967168  ;;  %s22_s23 = sadd.s32 1, %s865_s23   ;;  %s1073_s18 = smov %s849_s19 }
 0x183   : > { %p19_p7 = scmp.ge.s32.totalorder %s22_s23, 4   ;;  %s1074_s19 = smov %s853_s20 }
 0x184   : > { %s1075_s20 = smov %s980_s28  ;;  %s1076_s21 = smov %s861_s22 }
 0x185   : > { %s1077_s22 = smov %s1079_s14  ;;  %21 = sbr.rel (!%p19_p7) target bundleno = 7 (0x7), region = 102 }
 0x18a   :  { %486 = vsyncpa [#allocation3], 1 }
 0x18b   :  { %488 = vsyncpa [#allocation3 + $0x1], 1 }
 0x18c   :  { %489 = vsyncpa [#allocation6], 1 }
 0x18d   :  { %490 = vsyncpa [#allocation4], 1 }
 0x18e   :  { %492 = vsyncpa [#allocation4 + $0x1], 1 }

</bundles_post_ra>
